<compile_context>
chip_gen: v7x
topology: tpu7x:2x2x1
jax: 0.10.0
libtpu: 0.0.40
codegen_flags: <defaults>
</compile_context>

<pallas_src>
import functools

import jax
import jax.numpy as jnp
from jax.experimental import pallas as pl
from jax.experimental.pallas import tpu as pltpu


def _round_up(v, m):
    return ((v + m - 1) // m) * m


def _edge_map_kernel(x_ref, *rest, h_img, inv_scale, tiled, use_scratch):
    f32 = jnp.float32
    nb, n_ch, th, w_img = x_ref.shape

    if tiled:
        top_ref, bot_ref, out_ref = rest[0], rest[1], rest[2]
        scratch = rest[3] if use_scratch else None
    else:
        top_ref = bot_ref = None
        out_ref = rest[0]
        scratch = rest[1] if use_scratch else None

    thp, wp = scratch.shape if use_scratch else (th, w_img)
    h0 = pl.program_id(1) * th if tiled else 0
    sc = f32(inv_scale)

    # Small per-row / per-column validity & weight vectors (replaces full-size
    # int32 iotas + compare/select chains from the previous version).
    lrow = jax.lax.broadcasted_iota(jnp.int32, (thp, 1), 0)
    grow = lrow + h0                                     # global row index
    keep_row = (grow <= h_img - 2) & (lrow <= th - 2)    # rows owning a fwd diff
    w_row = jnp.where((grow > 0) & (grow < h_img - 1), f32(0.5), f32(1.0))
    col = jax.lax.broadcasted_iota(jnp.int32, (1, wp), 1)
    keep_col = col <= w_img - 2
    w_col = jnp.where((col > 0) & (col < w_img - 1), f32(0.5), f32(1.0))

    if tiled:
        have_top = h0 >= 1                        # a row exists above this tile
        have_bot = (h0 + th) <= (h_img - 1)       # a row exists below this tile
        w_top = jnp.where((h0 > 0) & (h0 < h_img - 1), f32(0.5), f32(1.0))
        w_bot = jnp.where(have_bot, f32(0.5), f32(1.0))

    for b in range(nb):
        # ---- channel-accumulated |forward differences| ----------------------
        acc_h = acc_w = acc_t = acc_b = None
        for c in range(n_ch):
            if use_scratch:
                # Stage the (possibly unaligned) slab into an (8,128)-aligned
                # f32 tile so the XLU rolls below stay on aligned shapes.
                scratch[:th, :w_img] = x_ref[b, c].astype(f32)
                xc = scratch[...]
            else:
                xc = x_ref[b, c].astype(f32)
            dh_c = jnp.abs(pltpu.roll(xc, thp - 1, 0) - xc)   # row r: |x[r+1]-x[r]|
            dw_c = jnp.abs(pltpu.roll(xc, wp - 1, 1) - xc)    # col w: |x[w+1]-x[w]|
            acc_h = dh_c if acc_h is None else acc_h + dh_c
            acc_w = dw_c if acc_w is None else acc_w + dw_c
            if tiled:
                x_top = x_ref[b, c, 0:1, :].astype(f32)
                x_bot = x_ref[b, c, th - 1:th, :].astype(f32)
                t_c = jnp.abs(x_top - top_ref[b, c, 7:8, :].astype(f32))
                b_c = jnp.abs(bot_ref[b, c, 0:1, :].astype(f32) - x_bot)
                acc_t = t_c if acc_t is None else acc_t + t_c
                acc_b = b_c if acc_b is None else acc_b + b_c

        # ---- scatter each difference onto both of its endpoints --------------
        dh = jnp.where(keep_row, acc_h, f32(0.0))   # zero wrap / pad / invalid rows
        dw = jnp.where(keep_col, acc_w, f32(0.0))   # zero wrap / pad / invalid cols
        gx = (dh + pltpu.roll(dh, 1, 0)) * w_row
        gy = (dw + pltpu.roll(dw, 1, 1)) * w_col
        edge = gx + gy
        if inv_scale != 1.0:
            edge = edge * sc
        edge = edge[:th, :w_img]                    # drop VMEM-only padding
        out_ref[b] = edge.astype(out_ref.dtype)

        if tiled:
            # Patch the two seam rows with the halo contribution.
            dh_top = jnp.where(have_top, acc_t, f32(0.0))
            dh_bot = jnp.where(have_bot, acc_b, f32(0.0))
            top_fix = edge[0:1, :] + dh_top * (w_top * sc)
            bot_fix = edge[th - 1:th, :] + dh_bot * (w_bot * sc)
            out_ref[b, 0:1, :] = top_fix.astype(out_ref.dtype)
            out_ref[b, th - 1:th, :] = bot_fix.astype(out_ref.dtype)


def edge_map(img, scale=1.0, *, rows_per_block=None):
    """Pallas implementation of EdgeMap.forward. img: (N, C, H, W) -> (N, 1, H, W)."""
    N, C, H, W = img.shape
    if not jnp.issubdtype(img.dtype, jnp.floating):
        img = img.astype(jnp.float32)        # mirror torch's true-division upcast
    out_dtype = img.dtype
    itemsize = jnp.dtype(img.dtype).itemsize
    wp = _round_up(W, 128)

    # ---- per-chip VMEM budget -------------------------------------------------
    try:
        vmem_cap = int(pltpu.get_tpu_info().vmem_capacity_bytes)
    except Exception:
        vmem_cap = 64 << 20                   # conservative: valid on every gen
    dual_tc = vmem_cap <= (64 << 20)          # v7x-like: 2 TensorCores per chip
    limit_cap = max(vmem_cap - (16 << 20), 16 << 20)
    size_budget = min(limit_cap - (8 << 20), 64 << 20)

    def est(nb, th):
        thp = _round_up(th, 8)
        e = 2 * nb * C * th * W * itemsize    # input blocks (double buffered)
        e += 2 * nb * th * W * itemsize       # output blocks
        e += 4 * nb * C * 8 * W * itemsize    # halo blocks (tiled path)
        e += thp * wp * 4                     # aligned staging scratch
        e += 8 * thp * wp * 4                 # f32 temporaries in the body
        return e + (2 << 20)

    # ---- pick the H tile --------------------------------------------------------
    if rows_per_block is not None:
        th = min(H, max(8, (int(rows_per_block) // 8) * 8))
    elif H <= 8 or est(1, H) <= size_budget:
        th = H
    else:
        base = est(1, 8)
        step = (est(1, 16) - base) // 8
        if base >= size_budget:
            fit = 8   # TODO(synk): add a W-tiled path for images too wide for 8 rows
        else:
            fit = 8 + 8 * int((size_budget - base) // (8 * step))
        th = max(8, min(fit, ((H - 1) // 8) * 8))
    tiled = th < H

    # ---- pick the batch block ---------------------------------------------------
    nb = 1
    if not tiled:
        for cand in range(1, min(N, 8) + 1):
            if N % cand == 0 and est(cand, th) <= size_budget:
                nb = cand
        if dual_tc and N > 1 and N // nb < 2:
            for cand in range(nb - 1, 0, -1):     # keep both TensorCores busy
                if N % cand == 0 and N // cand >= 2:
                    nb = cand
                    break
    n_ht = pl.cdiv(H, th) if tiled else 1

    use_scratch = (th % 8 != 0) or (W % 128 != 0)
    scratch_shapes = (
        [pltpu.VMEM((_round_up(th, 8), wp), jnp.float32)] if use_scratch else [])

    kernel = functools.partial(
        _edge_map_kernel,
        h_img=H,
        inv_scale=abs(1.0 / float(scale)),
        tiled=tiled,
        use_scratch=use_scratch,
    )

    if tiled:
        th8 = th // 8
        nb8 = pl.cdiv(H, 8)
        grid = (N // nb, n_ht)
        in_specs = [
            pl.BlockSpec((nb, C, th, W), lambda n, h: (n, 0, h, 0)),
            # 8-row slab just above the tile (its last row is the top halo).
            pl.BlockSpec((nb, C, 8, W),
                         lambda n, h: (n, 0, jnp.maximum(h * th8 - 1, 0), 0)),
            # 8-row slab just below the tile (its first row is the bottom halo).
            pl.BlockSpec((nb, C, 8, W),
                         lambda n, h: (n, 0, jnp.minimum((h + 1) * th8, nb8 - 1), 0)),
        ]
        out_specs = pl.BlockSpec((nb, None, th, W), lambda n, h: (n, 0, h, 0))
        operands = (img, img, img)
        dims = ("parallel", "parallel")
    else:
        grid = (N // nb,)
        in_specs = [pl.BlockSpec((nb, C, th, W), lambda n: (n, 0, 0, 0))]
        out_specs = pl.BlockSpec((nb, None, th, W), lambda n: (n, 0, 0, 0))
        operands = (img,)
        dims = ("parallel",)

    vmem_limit = int(min(limit_cap, max(est(nb, th) + (8 << 20), 32 << 20)))

    return pl.pallas_call(
        kernel,
        out_shape=jax.ShapeDtypeStruct((N, 1, H, W), out_dtype),
        grid=grid,
        in_specs=in_specs,
        out_specs=out_specs,
        scratch_shapes=scratch_shapes,
        compiler_params=pltpu.CompilerParams(
            dimension_semantics=dims,
            vmem_limit_bytes=vmem_limit),
    )(*operands)


def edge_map_ref(img, scale=1.0):
    """Pure-JAX reference matching the PyTorch semantics exactly."""
    img = img / scale
    N, C, H, W = img.shape
    gradx = jnp.abs(img[:, :, 1:, :] - img[:, :, :-1, :]).sum(axis=1, keepdims=True)
    grady = jnp.abs(img[:, :, :, 1:] - img[:, :, :, :-1]).sum(axis=1, keepdims=True)
    gradX = jnp.zeros((N, 1, H, W), img.dtype)
    gradY = jnp.zeros((N, 1, H, W), img.dtype)
    gradX = gradX.at[:, :, :-1, :].add(gradx)
    gradX = gradX.at[:, :, 1:, :].add(gradx)
    gradX = gradX.at[:, :, 1:-1, :].multiply(0.5)
    gradY = gradY.at[:, :, :, :-1].add(grady)
    gradY = gradY.at[:, :, :, 1:].add(grady)
    gradY = gradY.at[:, :, :, 1:-1].multiply(0.5)
    return gradX + gradY


if __name__ == "__main__":
    key = jax.random.PRNGKey(0)
    N, C, H, W = 2, 4, 16, 16
    x = jax.random.normal(key, (N, C, H, W), dtype=jnp.float32)

    # Default scale (== PyTorch module default); untiled path, unaligned W.
    out = jax.block_until_ready(edge_map(x, scale=1.0))
    ref = edge_map_ref(x, scale=1.0)
    assert out.shape == (N, 1, H, W), out.shape
    assert jnp.allclose(out, ref, atol=1e-5, rtol=1e-5), "mismatch (scale=1)"

    # Non-trivial scale exercises the factored-out |1/scale| path.
    out2 = jax.block_until_ready(edge_map(x, scale=2.0))
    ref2 = edge_map_ref(x, scale=2.0)
    assert jnp.allclose(out2, ref2, atol=1e-5, rtol=1e-5), "mismatch (scale=2)"

    # H-tiled (halo) path with a partial last tile and fully unaligned H / W.
    key2 = jax.random.split(key)[0]
    x3 = jax.random.normal(key2, (1, 3, 41, 24), dtype=jnp.float32)
    out3 = jax.block_until_ready(edge_map(x3, scale=1.0, rows_per_block=16))
    ref3 = edge_map_ref(x3, scale=1.0)
    assert out3.shape == (1, 1, 41, 24), out3.shape
    assert jnp.allclose(out3, ref3, atol=1e-5, rtol=1e-5), "mismatch (tiled)"

    print("KERNEL_OK")
</pallas_src>

<mosaic_0001>
module attributes {stable_mosaic.version = 11 : i64} {
  func.func @_edge_map_kernel(%arg0: i32, %arg1: memref<1x4x16x16xf32, #tpu.memory_space<vmem>>, %arg2: memref<1x1x16x16xf32, #tpu.memory_space<vmem>>, %arg3: memref<16x128xf32, #tpu.memory_space<vmem>>) attributes {dimension_semantics = [#tpu.dimension_semantics<parallel>], iteration_bounds = array<i64: 2>, scalar_prefetch = 0 : i64, scratch_operands = 1 : i64, tpu.core_type = #tpu.core_type<tc>, window_params = [{transform_indices = @transform_0, window_bounds = array<i64: 1, 4, 16, 16>}, {transform_indices = @transform_1, window_bounds = array<i64: 1, 1, 16, 16>}]} {
    %0 = tpu.iota {dimensions = array<i32: 0>} : vector<16x1xi32>
    %c0_i32 = arith.constant 0 : i32
    %1 = vector.broadcast %c0_i32 : i32 to vector<16x1xi32>
    %2 = arith.addi %0, %1 : vector<16x1xi32>
    %c14_i32 = arith.constant 14 : i32
    %3 = vector.broadcast %c14_i32 : i32 to vector<16x1xi32>
    %4 = arith.cmpi sle, %2, %3 : vector<16x1xi32>
    %c14_i32_0 = arith.constant 14 : i32
    %5 = vector.broadcast %c14_i32_0 : i32 to vector<16x1xi32>
    %6 = arith.cmpi sle, %0, %5 : vector<16x1xi32>
    %7 = arith.andi %4, %6 : vector<16x1xi1>
    %c0_i32_1 = arith.constant 0 : i32
    %8 = vector.broadcast %c0_i32_1 : i32 to vector<16x1xi32>
    %9 = arith.cmpi sgt, %2, %8 : vector<16x1xi32>
    %c15_i32 = arith.constant 15 : i32
    %10 = vector.broadcast %c15_i32 : i32 to vector<16x1xi32>
    %11 = arith.cmpi slt, %2, %10 : vector<16x1xi32>
    %12 = arith.andi %9, %11 : vector<16x1xi1>
    %cst = arith.constant 5.000000e-01 : f32
    %cst_2 = arith.constant 1.000000e+00 : f32
    %13 = vector.broadcast %cst : f32 to vector<16x1xf32>
    %14 = vector.broadcast %cst_2 : f32 to vector<16x1xf32>
    %15 = arith.select %12, %13, %14 : vector<16x1xi1>, vector<16x1xf32>
    %16 = tpu.iota {dimensions = array<i32: 1>} : vector<1x128xi32>
    %c14_i32_3 = arith.constant 14 : i32
    %17 = vector.broadcast %c14_i32_3 : i32 to vector<1x128xi32>
    %18 = arith.cmpi sle, %16, %17 : vector<1x128xi32>
    %c0_i32_4 = arith.constant 0 : i32
    %19 = vector.broadcast %c0_i32_4 : i32 to vector<1x128xi32>
    %20 = arith.cmpi sgt, %16, %19 : vector<1x128xi32>
    %c15_i32_5 = arith.constant 15 : i32
    %21 = vector.broadcast %c15_i32_5 : i32 to vector<1x128xi32>
    %22 = arith.cmpi slt, %16, %21 : vector<1x128xi32>
    %23 = arith.andi %20, %22 : vector<1x128xi1>
    %cst_6 = arith.constant 5.000000e-01 : f32
    %cst_7 = arith.constant 1.000000e+00 : f32
    %24 = vector.broadcast %cst_6 : f32 to vector<1x128xf32>
    %25 = vector.broadcast %cst_7 : f32 to vector<1x128xf32>
    %26 = arith.select %23, %24, %25 : vector<1x128xi1>, vector<1x128xf32>
    %c0 = arith.constant 0 : index
    %c0_8 = arith.constant 0 : index
    %c0_9 = arith.constant 0 : index
    %c0_10 = arith.constant 0 : index
    %27 = vector.load %arg1[%c0, %c0_8, %c0_9, %c0_10] : memref<1x4x16x16xf32, #tpu.memory_space<vmem>>, vector<1x1x16x16xf32>
    %28 = vector.shape_cast %27 : vector<1x1x16x16xf32> to vector<16x16xf32>
    %c0_11 = arith.constant 0 : index
    %c0_12 = arith.constant 0 : index
    %29 = vector.load %arg3[%c0_11, %c0_12] : memref<16x128xf32, #tpu.memory_space<vmem>>, vector<16x16xf32>
    tpu.vector_store %arg3[%c0_11, %c0_12], %28 {strides = array<i32>} : memref<16x128xf32, #tpu.memory_space<vmem>>, vector<16x16xf32>,
    %c0_13 = arith.constant 0 : index
    %c0_14 = arith.constant 0 : index
    %30 = vector.load %arg3[%c0_13, %c0_14] : memref<16x128xf32, #tpu.memory_space<vmem>>, vector<16x128xf32>
    %c15_i32_15 = arith.constant 15 : i32
    %31 = tpu.dynamic_rotate %30 by %c15_i32_15 dim 0 : vector<16x128xf32>, i32 -> vector<16x128xf32>
    %32 = arith.subf %31, %30 : vector<16x128xf32>
    %33 = math.absf %32 : vector<16x128xf32>
    %c127_i32 = arith.constant 127 : i32
    %34 = tpu.dynamic_rotate %30 by %c127_i32 dim 1 : vector<16x128xf32>, i32 -> vector<16x128xf32>
    %35 = arith.subf %34, %30 : vector<16x128xf32>
    %36 = math.absf %35 : vector<16x128xf32>
    %c0_16 = arith.constant 0 : index
    %c1 = arith.constant 1 : index
    %c0_17 = arith.constant 0 : index
    %c0_18 = arith.constant 0 : index
    %37 = vector.load %arg1[%c0_16, %c1, %c0_17, %c0_18] : memref<1x4x16x16xf32, #tpu.memory_space<vmem>>, vector<1x1x16x16xf32>
    %38 = vector.shape_cast %37 : vector<1x1x16x16xf32> to vector<16x16xf32>
    %c0_19 = arith.constant 0 : index
    %c0_20 = arith.constant 0 : index
    %39 = vector.load %arg3[%c0_19, %c0_20] : memref<16x128xf32, #tpu.memory_space<vmem>>, vector<16x16xf32>
    tpu.vector_store %arg3[%c0_19, %c0_20], %38 {strides = array<i32>} : memref<16x128xf32, #tpu.memory_space<vmem>>, vector<16x16xf32>,
    %c0_21 = arith.constant 0 : index
    %c0_22 = arith.constant 0 : index
    %40 = vector.load %arg3[%c0_21, %c0_22] : memref<16x128xf32, #tpu.memory_space<vmem>>, vector<16x128xf32>
    %c15_i32_23 = arith.constant 15 : i32
    %41 = tpu.dynamic_rotate %40 by %c15_i32_23 dim 0 : vector<16x128xf32>, i32 -> vector<16x128xf32>
    %42 = arith.subf %41, %40 : vector<16x128xf32>
    %43 = math.absf %42 : vector<16x128xf32>
    %c127_i32_24 = arith.constant 127 : i32
    %44 = tpu.dynamic_rotate %40 by %c127_i32_24 dim 1 : vector<16x128xf32>, i32 -> vector<16x128xf32>
    %45 = arith.subf %44, %40 : vector<16x128xf32>
    %46 = math.absf %45 : vector<16x128xf32>
    %47 = arith.addf %33, %43 : vector<16x128xf32>
    %48 = arith.addf %36, %46 : vector<16x128xf32>
    %c0_25 = arith.constant 0 : index
    %c2 = arith.constant 2 : index
    %c0_26 = arith.constant 0 : index
    %c0_27 = arith.constant 0 : index
    %49 = vector.load %arg1[%c0_25, %c2, %c0_26, %c0_27] : memref<1x4x16x16xf32, #tpu.memory_space<vmem>>, vector<1x1x16x16xf32>
    %50 = vector.shape_cast %49 : vector<1x1x16x16xf32> to vector<16x16xf32>
    %c0_28 = arith.constant 0 : index
    %c0_29 = arith.constant 0 : index
    %51 = vector.load %arg3[%c0_28, %c0_29] : memref<16x128xf32, #tpu.memory_space<vmem>>, vector<16x16xf32>
    tpu.vector_store %arg3[%c0_28, %c0_29], %50 {strides = array<i32>} : memref<16x128xf32, #tpu.memory_space<vmem>>, vector<16x16xf32>,
    %c0_30 = arith.constant 0 : index
    %c0_31 = arith.constant 0 : index
    %52 = vector.load %arg3[%c0_30, %c0_31] : memref<16x128xf32, #tpu.memory_space<vmem>>, vector<16x128xf32>
    %c15_i32_32 = arith.constant 15 : i32
    %53 = tpu.dynamic_rotate %52 by %c15_i32_32 dim 0 : vector<16x128xf32>, i32 -> vector<16x128xf32>
    %54 = arith.subf %53, %52 : vector<16x128xf32>
    %55 = math.absf %54 : vector<16x128xf32>
    %c127_i32_33 = arith.constant 127 : i32
    %56 = tpu.dynamic_rotate %52 by %c127_i32_33 dim 1 : vector<16x128xf32>, i32 -> vector<16x128xf32>
    %57 = arith.subf %56, %52 : vector<16x128xf32>
    %58 = math.absf %57 : vector<16x128xf32>
    %59 = arith.addf %47, %55 : vector<16x128xf32>
    %60 = arith.addf %48, %58 : vector<16x128xf32>
    %c0_34 = arith.constant 0 : index
    %c3 = arith.constant 3 : index
    %c0_35 = arith.constant 0 : index
    %c0_36 = arith.constant 0 : index
    %61 = vector.load %arg1[%c0_34, %c3, %c0_35, %c0_36] : memref<1x4x16x16xf32, #tpu.memory_space<vmem>>, vector<1x1x16x16xf32>
    %62 = vector.shape_cast %61 : vector<1x1x16x16xf32> to vector<16x16xf32>
    %c0_37 = arith.constant 0 : index
    %c0_38 = arith.constant 0 : index
    %63 = vector.load %arg3[%c0_37, %c0_38] : memref<16x128xf32, #tpu.memory_space<vmem>>, vector<16x16xf32>
    tpu.vector_store %arg3[%c0_37, %c0_38], %62 {strides = array<i32>} : memref<16x128xf32, #tpu.memory_space<vmem>>, vector<16x16xf32>,
    %c0_39 = arith.constant 0 : index
    %c0_40 = arith.constant 0 : index
    %64 = vector.load %arg3[%c0_39, %c0_40] : memref<16x128xf32, #tpu.memory_space<vmem>>, vector<16x128xf32>
    %c15_i32_41 = arith.constant 15 : i32
    %65 = tpu.dynamic_rotate %64 by %c15_i32_41 dim 0 : vector<16x128xf32>, i32 -> vector<16x128xf32>
    %66 = arith.subf %65, %64 : vector<16x128xf32>
    %67 = math.absf %66 : vector<16x128xf32>
    %c127_i32_42 = arith.constant 127 : i32
    %68 = tpu.dynamic_rotate %64 by %c127_i32_42 dim 1 : vector<16x128xf32>, i32 -> vector<16x128xf32>
    %69 = arith.subf %68, %64 : vector<16x128xf32>
    %70 = math.absf %69 : vector<16x128xf32>
    %71 = arith.addf %59, %67 : vector<16x128xf32>
    %72 = arith.addf %60, %70 : vector<16x128xf32>
    %cst_43 = arith.constant 0.000000e+00 : f32
    %73 = vector.shape_cast %7 : vector<16x1xi1> to vector<16x1xi1>
    %74 = vector.broadcast %73 : vector<16x1xi1> to vector<16x128xi1>
    %75 = vector.broadcast %cst_43 : f32 to vector<16x128xf32>
    %76 = arith.select %74, %71, %75 : vector<16x128xi1>, vector<16x128xf32>
    %cst_44 = arith.constant 0.000000e+00 : f32
    %77 = vector.shape_cast %18 : vector<1x128xi1> to vector<1x128xi1>
    %78 = vector.broadcast %77 : vector<1x128xi1> to vector<16x128xi1>
    %79 = vector.broadcast %cst_44 : f32 to vector<16x128xf32>
    %80 = arith.select %78, %72, %79 : vector<16x128xi1>, vector<16x128xf32>
    %c1_i32 = arith.constant 1 : i32
    %81 = tpu.dynamic_rotate %76 by %c1_i32 dim 0 : vector<16x128xf32>, i32 -> vector<16x128xf32>
    %82 = arith.addf %76, %81 : vector<16x128xf32>
    %83 = vector.broadcast %15 : vector<16x1xf32> to vector<16x128xf32>
    %84 = arith.mulf %82, %83 : vector<16x128xf32>
    %c1_i32_45 = arith.constant 1 : i32
    %85 = tpu.dynamic_rotate %80 by %c1_i32_45 dim 1 : vector<16x128xf32>, i32 -> vector<16x128xf32>
    %86 = arith.addf %80, %85 : vector<16x128xf32>
    %87 = vector.broadcast %26 : vector<1x128xf32> to vector<16x128xf32>
    %88 = arith.mulf %86, %87 : vector<16x128xf32>
    %89 = arith.addf %84, %88 : vector<16x128xf32>
    %90 = vector.extract_strided_slice %89 {offsets = [0, 0], sizes = [16, 16], strides = [1, 1]} : vector<16x128xf32> to vector<16x16xf32>
    %c0_46 = arith.constant 0 : index
    %c0_47 = arith.constant 0 : index
    %c0_48 = arith.constant 0 : index
    %c0_49 = arith.constant 0 : index
    %91 = vector.load %arg2[%c0_46, %c0_47, %c0_48, %c0_49] : memref<1x1x16x16xf32, #tpu.memory_space<vmem>>, vector<1x1x16x16xf32>
    %92 = vector.shape_cast %91 : vector<1x1x16x16xf32> to vector<16x16xf32>
    %93 = vector.shape_cast %90 : vector<16x16xf32> to vector<1x1x16x16xf32>
    tpu.vector_store %arg2[%c0_46, %c0_47, %c0_48, %c0_49], %93 {strides = array<i32>} : memref<1x1x16x16xf32, #tpu.memory_space<vmem>>, vector<1x1x16x16xf32>,
    return
  }
  func.func @transform_0(%arg0: i32) -> (i32, i32, i32, i32) {
    %c0_i32 = arith.constant 0 : i32
    %c0_i32_0 = arith.constant 0 : i32
    %c0_i32_1 = arith.constant 0 : i32
    %c0_i32_2 = arith.constant 0 : i32
    return %arg0, %c0_i32, %c0_i32_0, %c0_i32_1 : i32, i32, i32, i32
  }
  func.func @transform_1(%arg0: i32) -> (i32, i32, i32, i32) {
    %c0_i32 = arith.constant 0 : i32
    %c0_i32_0 = arith.constant 0 : i32
    %c0_i32_1 = arith.constant 0 : i32
    %c0_i32_2 = arith.constant 0 : i32
    return %arg0, %c0_i32, %c0_i32_0, %c0_i32_1 : i32, i32, i32, i32
  }
}

</mosaic_0001>

<bundles_post_ra>
// kernel: tpu_custom_call.1
= control target key start
LH: loop header
LB: loop body
LE: loop exit
PB: predicated region body
PF: predicated region fallthrough
CT: control target
= control target key end

     0   :  { %6 = vsyncpa [#allocation4], 0  ;;  %s812_s0 = inlined_call_operand.hbm [shape: f32[2,4,16,16], index: 0, kind: input, shape index: {}]   ;;  %s813_s1 = inlined_call_operand.hbm [shape: f32[2,1,16,16], index: 1, kind: output, shape index: {}]  }
   0x1   :  { %8 = vsyncpa [#allocation4 + $0x1], 0 }
   0x2   :  { %9 = vsyncpa [#allocation5], 0 }
   0x3   :  { %11 = vsyncpa [#allocation5 + $0x1], 0  ;;  %s570_s6 = smov 0   ;;  %s572_s7 = smov 0  }
   0x4   :  { %s574_s8 = smov 0   ;;  %s576_s9 = smov 0  }
   0x5 LB: > { %s591_s10 = sadd.s32 4294967295, %s549_s9   ;;  %s378_s11 = sadd.s32 4294967294, %s549_s9   ;;  %s549_s9 = sphi %s576_s9, %s826_s9   ;;  %s545_s8 = sphi %s574_s8, %s825_s8   ;;  %s541_s7 = sphi %s572_s7, %s824_s7   ;;  %s537_s6 = sphi %s570_s6, %s823_s6  }
   0x6   : > { %s595_s12 = sadd.s32 1, %s549_s9   ;;  %s24_s13 = sadd.s32 1, %s545_s8 }
   0x7   : > { %s21_s14 = ssub.s32 %s549_s9, %s595_s12  ;;  %p31_p0 = scmp.ne.s32.totalorder %s545_s8, %s541_s7 }
   0x8   : > { %p22_p1 = scmp.eq.s32.totalorder %s21_s14, 0  ;;  %p32_p2 = scmp.eq.s32.totalorder %s549_s9, 0 }
   0x9   : > { %p37_p3 = scmp.ne.s32.totalorder %s541_s7, %s537_s6  ;;  %p38_p4 = scmp.eq.s32.totalorder %s591_s10, 0 }
   0xa   : > { %s607_s15 = scalar_select %p22_p1, %s545_s8, %s24_s13  }
   0xb   : > { %p609_p5 = por %p32_p2, %p31_p0  ;;  %p613_p6 = por %p38_p4, %p37_p3 }
   0xc   : > { %p61_p7 = scmp.eq.s32.totalorder %s591_s10, 1  ;;  %p67_p8 = scmp.eq.s32.totalorder %s378_s11, 1 }
   0xd   : > { %p412_p10 = scmp.lt.s32.totalorder %s549_s9, 2  ;;  %s87_s20 = sand.u32 1, %s545_s8  }
   0xe   : > { %p620_p11 = por %p61_p7, %p31_p0  ;;  %p624_p12 = por %p67_p8, %p37_p3 }
   0xf   : > { %s398_s21 = sshll.u32 %s549_s9, 10  ;;  %s381_s22 = sshll.u32 %s87_s20, 6 }
  0x10   : > { %s817_s18 = scalar_select %p620_p11, 1, 0 }
  0x11   : > { %s818_s19 = scalar_select %p624_p12, 1, 0 }
  0x12   : > { %s633_s25 = scalar_lea.hbm %s812_s0, %s398_s21  ;;  %s91_s26 = scalar_lea.vmem [#allocation3], %s381_s22 }
  0x13   : > { %s98_s27 = sshll.u32 %s91_s26, 4  ;;  %p637_p13 = pnand %p412_p10, %p609_p5  ;;  %s641_s27 = int_to_ptr.vmem [resolvable:$true] %s98_s27 }
  0x14   : > { %s643_s29 = scalar_lea.sflag [#allocation4], %s87_s20  ;;  %s453_s30 = scalar_lea.hbm %s633_s25, 1024 }
  0x15   : > { %p454_p0 = scmp.ne.s32.totalorder %s633_s25, %s453_s30  ;;  %p455_p1 = pneg %p637_p13 }
  0x16   : > { %s458_s4 = scalar_lea.hbm %s812_s0, 2048  ;;  %p459_p4 = scmp.lt.u32.totalorder %s633_s25, %s812_s0 }
  0x17   : > { %p456_p2 = pnand %p455_p1, %p454_p0  ;;  %p460_p5 = scmp.lt.u32.totalorder %s458_s4, %s453_s30 }
  0x18   : > { %p462_p8 = scmp.lt.u32.totalorder %s453_s30, %s633_s25 }
  0x19   : > { %p457_p3 = pneg %p456_p2  ;;  %p461_p7 = por %p460_p5, %p459_p4 }
  0x1b   : > { %p463_p10 = por %p462_p8, %p461_p7 }
  0x1d   : > { %p464_p9 = pnand %p463_p10, %p457_p3 }
  0x1f   : > { %467 = shalt.err (!%p464_p9)
}
  0x20   : > { %s468_s13 = scalar_lea.vmem %s641_s27, 1024  ;;  %s551_s14 = smov [#allocation3]  }
  0x21   : > { %p469_p0 = scmp.ne.s32.totalorder %s641_s27, %s468_s13  ;;  %s473_s16 = sshll.u32 %s551_s14, 4  ;;  %s474_s16 = int_to_ptr.vmem [resolvable:$false] %s473_s16 }
  0x22   : > { %s475_s20 = scalar_lea.vmem %s474_s16, 2048  ;;  %p476_p11 = scmp.lt.s32.totalorder %s641_s27, %s474_s16 }
  0x23   : > { %p471_p2 = pnand %p469_p0, %p455_p1  ;;  %p477_p4 = scmp.lt.s32.totalorder %s475_s20, %s468_s13 }
  0x25   : > { %p472_p12 = pneg %p471_p2  ;;  %p478_p5 = por %p477_p4, %p476_p11 }
  0x27   : > { %p479_p7 = pnand %p478_p5, %p472_p12 }
  0x29   : > { %482 = shalt.err (!%p479_p7)
}
  0x2a   : > { %s552_s21 = smov 128   ;;  %s553_s22 = smov 8  }
  0x2b   : > { %407 = dma.hbm_to_vmem [thread:$0]  (!%p637_p13), %s633_s25, 1024, %s641_s27, %s643_s29, %s552_s21, %s552_s21, %s553_s22  }
  0x2c   : > { %p384_p9 = scmp.ge.s32.totalorder %s549_s9, 1  ;;  %p106_p1 = scmp.lt.s32.totalorder %s549_s9, 3 }
  0x2e   : > { %p107_p3 = pnand %p384_p9, %p106_p1 }
  0x2f   : > { %s674_s23 = sand.u32 (!%p107_p3), 1, %s541_s7  }
  0x30   : > { %110 = sbr.rel (%p107_p3) target bundleno = 347 (0x15b), region = 24  ;;  %s385_s24 = sshll.u32 (!%p107_p3), %s674_s23, 6 }
  0x31   : > { %s113_s26 = scalar_lea.sflag (!%p107_p3), [#allocation4], %s674_s23  ;;  %s116_s30 = scalar_lea.vmem (!%p107_p3), [#allocation3], %s385_s24 }
  0x37   : > { %528 = dma.done.wait (%p613_p6), %s113_s26, 1024  }
  0x38   : > { %530 = vsyncadd (%p613_p6), %s113_s26, 4294966272  ;;  %vm157_vm0 = vcmask 130048   ;;  %v155_v0 = vld [vmem:[%s116_s30] sm:$0xff]  ;;  %v156_v1 = vld [vmem:[%s116_s30 + $0x8] sm:$0xff]  ;;  %s554_s25 = smov 127   ;;  %v135_v27 = vlaneseq  ;;  %s555_s17 = smov 1  }
  0x39   : > { %158 = vst.msk [vmem:[#allocation2] sm:$0xff] %vm157_vm0, %v155_v0  ;;  %159 = vst.msk [vmem:[#allocation2 + $0x8] sm:$0xff] %vm157_vm0, %v156_v1  ;;  %v387_v2 = vld [vmem:[%s116_s30 + $0x10] sm:$0xff]  ;;  %v388_v3 = vld [vmem:[%s116_s30 + $0x18] sm:$0xff]  ;;  %s386_s27 = sshll.u32 %s674_s23, 4  ;;  %s399_s28 = sshll.u32 %s591_s10, 8 }
  0x3a   : > { %v389_v6 = vld [vmem:[%s116_s30 + $0x20] sm:$0xff]  ;;  %v390_v7 = vld [vmem:[%s116_s30 + $0x28] sm:$0xff]  ;;  %v391_v10 = vld [vmem:[%s116_s30 + $0x30] sm:$0xff]  ;;  %v720_v37 = vand.u32 127, %v135_v27  ;;  %v136_v50 = vshrl.u32 %v135_v27, 7  ;;  %s134_s29 = scalar_lea.vmem [#allocation6], %s386_s27  ;;  %s764_s5 = scalar_lea.hbm %s813_s1, %s399_s28 }
  0x3b   : > { %v392_v11 = vld [vmem:[%s116_s30 + $0x38] sm:$0xff]  ;;  %s305_s2 = sshll.u32 %s134_s29, 4  ;;  %s292_s10 = scalar_lea.sflag [#allocation5], %s674_s23  ;;  %s766_s2 = int_to_ptr.vmem [resolvable:$true] %s305_s2 }
  0x3c   : > { %vm150_vm1 = vcmp.le.s32.totalorder %v720_v37, 14  ;;  %vm164_vm2 = vcmp.lt.s32.totalorder %v136_v50, 7  ;;  %vm272_vm4 = vcmp.lt.s32.totalorder %v136_v50, 1  ;;  %vm151_vm5 = vcmp.gt.s32.totalorder %v720_v37, 0  ;;  %s483_s11 = scalar_lea.vmem %s766_s2, 256  ;;  %p820_p11 = scmp.ne.s32.totalorder %s817_s18, 0 }
  0x3d   : > { %vm152_vm6 = vcmp.lt.s32.totalorder %v720_v37, 15  ;;  %vm140_vm7 = vcmp.gt.s32.totalorder %v136_v50, 0  ;;  %p484_p6 = scmp.ne.s32.totalorder %s766_s2, %s483_s11  ;;  %s557_s13 = smov [#allocation6]  }
  0x3e   : > { %vm153_vm9 = vmand %vm151_vm5, %vm152_vm6  ;;  %s487_s14 = sshll.u32 %s557_s13, 4  ;;  %s488_s14 = int_to_ptr.vmem [resolvable:$false] %s487_s14 }
  0x3f   : > { %p485_p12 = pnand %p484_p6, %p820_p11  ;;  %s489_s16 = scalar_lea.vmem %s488_s14, 512 }
  0x40   : > { %v684_v4 = vld [vmem:[#allocation2] sm:$0xff]  ;;  %v688_v5 = vld [vmem:[#allocation2 + $0x8] sm:$0xff]  ;;  %p490_p8 = scmp.lt.s32.totalorder %s766_s2, %s488_s14  ;;  %p491_p10 = scmp.lt.s32.totalorder %s489_s16, %s483_s11 }
  0x41   : > { %171 = vrot.lane.b32.xlu0 %v684_v4, %s554_s25  ;;  %182 = vst.msk [vmem:[#allocation2] sm:$0xff] %vm157_vm0, %v387_v2  ;;  %183 = vst.msk [vmem:[#allocation2 + $0x8] sm:$0xff] %vm157_vm0, %v388_v3  ;;  %v162_v51 = vrot.slane %v684_v4, 1  ;;  %v163_v53 = vrot.slane %v688_v5, 1  ;;  %p486_p13 = pneg %p485_p12 }
  0x42   : > { %p492_p0 = por %p491_p10, %p490_p8 }
  0x43   : > { %v166_v57 = vsel %vm164_vm2, %v163_v53, %v162_v51  ;;  %v165_v59 = vsel %vm164_vm2, %v162_v51, %v163_v53 }
  0x44   : > { %v168_v61 = vsub.f32 %v166_v57, %v688_v5  ;;  %v167_v2 = vsub.f32 %v165_v59, %v684_v4  ;;  %p493_p2 = pnand %p492_p0, %p486_p13 }
  0x45   : > { %173 = vrot.lane.b32.xlu0 %v688_v5, %s554_s25 }
  0x48   : > { %v692_v8 = vld [vmem:[#allocation2] sm:$0xff]  ;;  %v696_v9 = vld [vmem:[#allocation2 + $0x8] sm:$0xff] }
  0x49   : > { %194 = vrot.lane.b32.xlu1 %v692_v8, %s554_s25  ;;  %209 = vst.msk [vmem:[#allocation2] sm:$0xff] %vm157_vm0, %v389_v6  ;;  %210 = vst.msk [vmem:[#allocation2 + $0x8] sm:$0xff] %vm157_vm0, %v390_v7  ;;  %v186_v52 = vrot.slane %v692_v8, 1  ;;  %v187_v54 = vrot.slane %v696_v9, 1  ;;  %v170_v7 = vand.u32 2147483647, %v168_v61 }
  0x4b   : > { %v189_v58 = vsel %vm164_vm2, %v187_v54, %v186_v52  ;;  %v188_v60 = vsel %vm164_vm2, %v186_v52, %v187_v54 }
  0x4c   : > { %v191_v62 = vsub.f32 %v189_v58, %v696_v9  ;;  %v190_v3 = vsub.f32 %v188_v60, %v692_v8 }
  0x4d   : > { %196 = vrot.lane.b32.xlu1 %v696_v9, %s554_s25 }
  0x50   : > { %v700_v12 = vld [vmem:[#allocation2] sm:$0xff]  ;;  %v704_v13 = vld [vmem:[#allocation2 + $0x8] sm:$0xff] }
  0x51   : > { %221 = vrot.lane.b32.xlu0 %v700_v12, %s554_s25  ;;  %236 = vst.msk [vmem:[#allocation2] sm:$0xff] %vm157_vm0, %v391_v10  ;;  %237 = vst.msk [vmem:[#allocation2 + $0x8] sm:$0xff] %vm157_vm0, %v392_v11  ;;  %223 = vrot.lane.b32.xlu1 %v704_v13, %s554_s25  ;;  %v213_v55 = vrot.slane %v700_v12, 1  ;;  %v214_v56 = vrot.slane %v704_v13, 1  ;;  %v193_v10 = vand.u32 2147483647, %v191_v62 }
  0x53   : > { %v216_v1 = vsel %vm164_vm2, %v214_v56, %v213_v55  ;;  %v215_v6 = vsel %vm164_vm2, %v213_v55, %v214_v56 }
  0x54   : > { %v218_v11 = vsub.f32 %v216_v1, %v704_v13 }
  0x58   : > { %v708_v14 = vld [vmem:[#allocation2] sm:$0xff]  ;;  %v710_v15 = vld [vmem:[#allocation2 + $0x8] sm:$0xff] }
  0x59   : > { %248 = vrot.lane.b32.xlu0 %v708_v14, %s554_s25  ;;  %250 = vrot.lane.b32.xlu1 %v710_v15, %s554_s25  ;;  %v241_v63 = vrot.slane %v710_v15, 1  ;;  %v240_v0 = vrot.slane %v708_v14, 1 }
  0xb3   : > { %v172_v16 = vpop.permute.xlu0 %171 }
  0xb4   : > { %v175_v23 = vsub.f32 %v172_v16, %v684_v4  ;;  %v169_v16 = vand.u32 2147483647, %v167_v2  ;;  %v220_v4 = vand.u32 2147483647, %v218_v11 }
  0xb6   : > { %v177_v31 = vand.u32 2147483647, %v175_v23 }
  0xb7   : > { %v174_v18 = vpop.permute.xlu0 %173 }
  0xb8   : > { %v176_v20 = vsub.f32 %v174_v18, %v688_v5  ;;  %v243_v5 = vsel %vm164_vm2, %v241_v63, %v240_v0  ;;  %v242_v18 = vsel %vm164_vm2, %v240_v0, %v241_v63 }
  0xba   : > { %v178_v28 = vand.u32 2147483647, %v176_v20  ;;  %v203_v20 = vadd.f32 %v193_v10, %v170_v7 }
  0xbb   : > { %v195_v17 = vpop.permute.xlu1 %194 }
  0xbc   : > { %v198_v24 = vsub.f32 %v195_v17, %v692_v8  ;;  %v217_v17 = vsub.f32 %v215_v6, %v700_v12  ;;  %v230_v23 = vadd.f32 %v220_v4, %v203_v20 }
  0xbe   : > { %v200_v32 = vand.u32 2147483647, %v198_v24  ;;  %v219_v8 = vand.u32 2147483647, %v217_v17 }
  0xbf   : > { %v197_v19 = vpop.permute.xlu1 %196 }
  0xc0   : > { %v199_v21 = vsub.f32 %v197_v19, %v696_v9  ;;  %v204_v38 = vadd.f32 %v200_v32, %v177_v31  ;;  %v192_v9 = vand.u32 2147483647, %v190_v3  ;;  %v245_v19 = vsub.f32 %v243_v5, %v710_v15 }
  0xc2   : > { %v201_v29 = vand.u32 2147483647, %v199_v21  ;;  %v202_v21 = vadd.f32 %v192_v9, %v169_v16  ;;  %v247_v24 = vand.u32 2147483647, %v245_v19 }
  0xc3   : > { %v222_v22 = vpop.permute.xlu0 %221  ;;  %v224_v25 = vpop.permute.xlu1 %223 }
  0xc4   : > { %v225_v26 = vsub.f32 %v222_v22, %v700_v12  ;;  %v226_v30 = vsub.f32 %v224_v25, %v704_v13  ;;  %v205_v34 = vadd.f32 %v201_v29, %v178_v28  ;;  %v244_v22 = vsub.f32 %v242_v18, %v708_v14 }
  0xc5   : > { %v137_v13 = vadd.s32 8, %v136_v50  ;;  %v229_v25 = vadd.f32 %v219_v8, %v202_v21  ;;  %v257_v27 = vadd.f32 %v247_v24, %v230_v23 }
  0xc6   : > { %v227_v33 = vand.u32 2147483647, %v225_v26  ;;  %v228_v35 = vand.u32 2147483647, %v226_v30  ;;  %v246_v26 = vand.u32 2147483647, %v244_v22 }
  0xc7   : > { %vm139_vm3 = vcmp.le.s32.totalorder %v137_v13, 14  ;;  %vm143_vm8 = vcmp.lt.s32.totalorder %v137_v13, 15 }
  0xc8   : > { %v231_v42 = vadd.f32 %v227_v33, %v204_v38  ;;  %v232_v44 = vadd.f32 %v228_v35, %v205_v34  ;;  %v256_v28 = vadd.f32 %v246_v26, %v229_v25  ;;  %v265_v12 = vsel %vm139_vm3, %v257_v27, 0.0 }
  0xc9   : > { %v271_v30 = vrot.slane %v265_v12, 7  ;;  %v556_v33 = vmov 1.0  }
  0xca   : > { %v270_v29 = vrot.slane %v256_v28, 7  ;;  %v146_v34 = vsel %vm140_vm7, 0.5, %v556_v33  ;;  %v147_v35 = vsel %vm143_vm8, 0.5, %v556_v33 }
  0xcb   : > { %v249_v36 = vpop.permute.xlu0 %248  ;;  %v251_v39 = vpop.permute.xlu1 %250 }
  0xcc   : > { %v252_v40 = vsub.f32 %v249_v36, %v708_v14  ;;  %v253_v41 = vsub.f32 %v251_v39, %v710_v15  ;;  %v274_v15 = vsel %vm272_vm4, %v271_v30, %v270_v29  ;;  %v273_v31 = vsel %vm272_vm4, %v270_v29, %v271_v30 }
  0xcd   : > { %v275_v14 = vadd.f32 %v274_v15, %v256_v28  ;;  %v276_v32 = vadd.f32 %v273_v31, %v265_v12  ;;  %v154_v36 = vsel %vm153_vm9, 0.5, %v556_v33 }
  0xce   : > { %v254_v43 = vand.u32 2147483647, %v252_v40  ;;  %v255_v45 = vand.u32 2147483647, %v253_v41 }
  0xcf   : > { %v277_v40 = vmul.f32 %v275_v14, %v146_v34  ;;  %v278_v37 = vmul.f32 %v276_v32, %v147_v35 }
  0xd0   : > { %v258_v46 = vadd.f32 %v254_v43, %v231_v42  ;;  %v259_v47 = vadd.f32 %v255_v45, %v232_v44 }
  0xd2   : > { %v725_v48 = vsel %vm150_vm1, %v258_v46, 0.0  ;;  %v727_v49 = vsel %vm150_vm1, %v259_v47, 0.0 }
  0xd3   : > { %279 = vrot.lane.b32.xlu0 %v725_v48, %s555_s17  ;;  %281 = vrot.lane.b32.xlu1 %v727_v49, %s555_s17 }
 0x145   : > { %v280_v38 = vpop.permute.xlu0 %279  ;;  %v282_v39 = vpop.permute.xlu1 %281 }
 0x146   : > { %v283_v41 = vadd.f32 %v280_v38, %v725_v48  ;;  %v284_v42 = vadd.f32 %v282_v39, %v727_v49 }
 0x148   : > { %v285_v43 = vmul.f32 %v283_v41, %v154_v36  ;;  %v286_v44 = vmul.f32 %v284_v42, %v154_v36 }
 0x14a   : > { %v287_v45 = vadd.f32 %v285_v43, %v277_v40  ;;  %v288_v46 = vadd.f32 %v286_v44, %v278_v37 }
 0x14c   : > { %289 = vst.msk [vmem:[%s134_s29] sm:$0xff] %vm157_vm0, %v287_v45  ;;  %290 = vst.msk [vmem:[%s134_s29 + $0x8] sm:$0xff] %vm157_vm0, %v288_v46 }
 0x14d   : > { %496 = shalt.err (!%p493_p2)
}
 0x14e   : > { %s497_s20 = scalar_lea.hbm %s764_s5, 256  ;;  %s501_s24 = scalar_lea.hbm %s813_s1, 512 }
 0x14f   : > { %p498_p4 = scmp.ne.s32.totalorder %s764_s5, %s497_s20  ;;  %p502_p9 = scmp.lt.u32.totalorder %s764_s5, %s813_s1 }
 0x150   : > { %p503_p1 = scmp.lt.u32.totalorder %s501_s24, %s497_s20  ;;  %p505_p6 = scmp.lt.u32.totalorder %s497_s20, %s764_s5 }
 0x151   : > { %p499_p5 = pnand %p498_p4, %p820_p11 }
 0x152   : > { %p504_p3 = por %p503_p1, %p502_p9 }
 0x153   : > { %p500_p7 = pneg %p499_p5 }
 0x154   : > { %p506_p12 = por %p505_p6, %p504_p3 }
 0x156   : > { %p507_p13 = pnand %p506_p12, %p500_p7 }
 0x158   : > { %510 = shalt.err (!%p507_p13)
}
 0x159   : > { %s558_s25 = smov 128   ;;  %s559_s17 = smov 8  }
 0x15a   : > { %402 = dma.vmem_to_hbm [thread:$0]  (%p820_p11), %s766_s2, 256, %s764_s5, %s292_s10, %s558_s25, %s558_s25, %s559_s17  }
 0x15b PF: > { %s320_s27 = sand.u32 1, %s537_s6   ;;  %p821_p8 = scmp.ne.s32.totalorder %s818_s19, 0 }
 0x15c   : > { %p822_p10 = scmp.ge.s32.totalorder %s549_s9, 2  ;;  %s321_s28 = scalar_lea.sflag [#allocation5], %s320_s27 }
 0x15e   : > { %p409_p0 = pnand %p822_p10, %p821_p8 }
 0x160   : > { %532 = dma.done.wait (!%p409_p0), %s321_s28, 256  }
 0x161   : > { %534 = vsyncadd (!%p409_p0), %s321_s28, 4294967040  ;;  %p14_p2 = scmp.ge.s32.totalorder %s595_s12, 4   ;;  %s823_s6 = smov %s541_s7 }
 0x162   : > { %s824_s7 = smov %s545_s8  ;;  %s825_s8 = smov %s607_s15 }
 0x163   : > { %s826_s9 = smov %s595_s12  ;;  %16 = sbr.rel (!%p14_p2) target bundleno = 5 (0x5), region = 72 }
 0x16a   :  { %326 = vsyncpa [#allocation4], 1 }
 0x16b   :  { %328 = vsyncpa [#allocation4 + $0x1], 1 }
 0x16c   :  { %329 = vsyncpa [#allocation5], 1 }
 0x16d   :  { %331 = vsyncpa [#allocation5 + $0x1], 1 }

</bundles_post_ra>
